<compile_context>
chip_gen: v7x
topology: tpu7x:2x2x1
jax: 0.10.0
libtpu: 0.0.40
codegen_flags: <defaults>
</compile_context>

<pallas_src>
import functools

import jax
import jax.numpy as jnp
from jax import lax
from jax.experimental import pallas as pl
from jax.experimental.pallas import tpu as pltpu


def _vmem_limit_bytes():
    # ~40 MiB on v7x (64 MiB physical), ~104 MiB on v5e/v6e (128 MiB physical).
    try:
        cap = int(pltpu.get_tpu_info().vmem_capacity_bytes)
        return max(cap - 24 * 1024 * 1024, 32 * 1024 * 1024)
    except Exception:
        return None  # compiler default


_VMEM_LIMIT = _vmem_limit_bytes()


def _fit(dim, preferred, align):
    """Largest multiple of `align` that divides `dim` and is <= `preferred`.
    Falls back to the full dim (block == array extent is always legal)."""
    if dim <= preferred:
        return dim
    t = (preferred // align) * align
    while t >= align:
        if dim % t == 0:
            return t
        t -= align
    return dim


# ----------------------------------------------------------------------------
# Kernel 1: tiled matmul (bf16 MXU operands, fp32 accumulation, bf16 output)
#   used for the fused QKV projection (and separate projections for cross-attn)
# ----------------------------------------------------------------------------
def _matmul_kernel(x_ref, w_ref, o_ref, acc_ref):
    @pl.when(pl.program_id(2) == 0)
    def _():
        acc_ref[...] = jnp.zeros_like(acc_ref)

    acc_ref[...] += jnp.dot(
        x_ref[...].astype(jnp.bfloat16),
        w_ref[...].astype(jnp.bfloat16),
        preferred_element_type=jnp.float32,
    )

    @pl.when(pl.program_id(2) == pl.num_programs(2) - 1)
    def _():
        o_ref[...] = acc_ref[...].astype(o_ref.dtype)


def matmul_bf16(x, w, *, out_dtype=jnp.bfloat16, tm=512, tn=512, tk=512):
    """x: (M, K) @ w: (K, N) -> (M, N).  Weights already in (in, out) layout."""
    M, K = x.shape
    K2, N = w.shape
    assert K == K2
    tm, tn, tk = _fit(M, tm, 8), _fit(N, tn, 128), _fit(K, tk, 128)
    return pl.pallas_call(
        _matmul_kernel,
        out_shape=jax.ShapeDtypeStruct((M, N), out_dtype),
        grid=(M // tm, N // tn, K // tk),
        in_specs=[
            pl.BlockSpec((tm, tk), lambda i, j, l: (i, l)),
            pl.BlockSpec((tk, tn), lambda i, j, l: (l, j)),
        ],
        out_specs=pl.BlockSpec((tm, tn), lambda i, j, l: (i, j)),
        scratch_shapes=[pltpu.VMEM((tm, tn), jnp.float32)],
        compiler_params=pltpu.CompilerParams(
            dimension_semantics=("parallel", "parallel", "arbitrary"),
            vmem_limit_bytes=_VMEM_LIMIT,
        ),
    )(x, w)


# ----------------------------------------------------------------------------
# Kernel 2: flash attention over (B, L, H*d)-layout inputs.
#   grid = (B, Lq//tq, Lk//tk); per-head lane slices inside the kernel (no wrapper
#   transposes); online softmax state (m, l, acc) in VMEM scratch.
#   Outputs: lane-dense ctx (B, Lq, H*d_v) bf16 + per-head LSE (B, H, Lq, 1) fp32.
# ----------------------------------------------------------------------------
def _flash_kernel(*refs, n_head, d_k, d_v, has_bias):
    if has_bias:
        q_ref, k_ref, v_ref, bias_ref, o_ref, lse_ref, m_sc, l_sc, acc_sc = refs
    else:
        q_ref, k_ref, v_ref, o_ref, lse_ref, m_sc, l_sc, acc_sc = refs
        bias_ref = None

    ki = pl.program_id(2)

    @pl.when(ki == 0)
    def _():
        m_sc[...] = jnp.full(m_sc.shape, -jnp.inf, dtype=m_sc.dtype)
        l_sc[...] = jnp.zeros_like(l_sc)
        acc_sc[...] = jnp.zeros_like(acc_sc)

    qv = q_ref[0]                       # (tq, H*d_k) bf16  (scale folded into W_q)
    kv = k_ref[0]                       # (tk, H*d_k) bf16
    vv = v_ref[0]                       # (tk, H*d_v) bf16
    bias = bias_ref[0].astype(jnp.float32) if has_bias else None   # (tq, tk)

    for h in range(n_head):
        qh = qv[:, h * d_k:(h + 1) * d_k]                           # (tq, d_k)
        kh = kv[:, h * d_k:(h + 1) * d_k]                           # (tk, d_k)
        vh = vv[:, h * d_v:(h + 1) * d_v]                           # (tk, d_v)
        s = lax.dot_general(qh, kh, (((1,), (1,)), ((), ())),
                            preferred_element_type=jnp.float32)     # (tq, tk)
        if has_bias:
            s = s + bias                                            # additive mask
        m_prev = m_sc[h]                                            # (tq, 1)
        m_new = jnp.maximum(m_prev, jnp.max(s, axis=-1, keepdims=True))
        alpha = jnp.exp(m_prev - m_new)
        p = jnp.exp(s - m_new)
        l_sc[h] = alpha * l_sc[h] + jnp.sum(p, axis=-1, keepdims=True)
        acc_sc[h] = alpha * acc_sc[h] + jnp.dot(
            p.astype(jnp.bfloat16), vh, preferred_element_type=jnp.float32)
        m_sc[h] = m_new

    @pl.when(ki == pl.num_programs(2) - 1)
    def _():
        # Store each head's normalized context straight into its lane slice
        # (exact division: runs once per qi tile, keeps parity with the attn kernel).
        for h in range(n_head):
            o_ref[0, :, h * d_v:(h + 1) * d_v] = (acc_sc[h] / l_sc[h]).astype(o_ref.dtype)
        lse_ref[0] = m_sc[...] + jnp.log(l_sc[...])                 # (H, tq, 1)


def flash_attention(q_arr, k_arr, v_arr, *, n_head, d_k, d_v,
                    q_col=0, k_col=0, v_col=0, bias=None, tq=256, tk=512):
    """q/k/v arrays in (B, L, C) layout; the head block of each array starts at
    column block q_col/k_col/v_col (units of H*d).  Returns (ctx bf16, lse fp32)."""
    B, Lq, _ = q_arr.shape
    Lk = k_arr.shape[1]
    tq = _fit(Lq, tq, 8)
    tk = _fit(Lk, tk, 128)
    has_bias = bias is not None

    in_specs = [
        pl.BlockSpec((1, tq, n_head * d_k), lambda b, qi, ki, c=q_col: (b, qi, c)),
        pl.BlockSpec((1, tk, n_head * d_k), lambda b, qi, ki, c=k_col: (b, ki, c)),
        pl.BlockSpec((1, tk, n_head * d_v), lambda b, qi, ki, c=v_col: (b, ki, c)),
    ]
    args = [q_arr, k_arr, v_arr]
    if has_bias:
        if bias.shape[0] == 1:   # batch-invariant mask: reuse block 0 for every b
            in_specs.append(pl.BlockSpec((1, tq, tk), lambda b, qi, ki: (0, qi, ki)))
        else:
            in_specs.append(pl.BlockSpec((1, tq, tk), lambda b, qi, ki: (b, qi, ki)))
        args.append(bias)

    kernel = functools.partial(_flash_kernel, n_head=n_head, d_k=d_k, d_v=d_v,
                               has_bias=has_bias)
    return pl.pallas_call(
        kernel,
        out_shape=(
            jax.ShapeDtypeStruct((B, Lq, n_head * d_v), jnp.bfloat16),
            jax.ShapeDtypeStruct((B, n_head, Lq, 1), jnp.float32),
        ),
        grid=(B, Lq // tq, Lk // tk),
        in_specs=in_specs,
        out_specs=(
            pl.BlockSpec((1, tq, n_head * d_v), lambda b, qi, ki: (b, qi, 0)),
            pl.BlockSpec((1, n_head, tq, 1), lambda b, qi, ki: (b, 0, qi, 0)),
        ),
        scratch_shapes=[
            pltpu.VMEM((n_head, tq, 1), jnp.float32),    # running max m
            pltpu.VMEM((n_head, tq, 1), jnp.float32),    # running sum l
            pltpu.VMEM((n_head, tq, d_v), jnp.float32),  # accumulator
        ],
        compiler_params=pltpu.CompilerParams(
            dimension_semantics=("parallel", "parallel", "arbitrary"),
            vmem_limit_bytes=_VMEM_LIMIT,
        ),
    )(*args)


# ----------------------------------------------------------------------------
# Kernel 3: attention-probability materialization (module returns `attn`).
#   Fully tiled over (B, Lq, Lk): recompute the cheap QK^T block and normalize
#   with the LSE from the flash pass -> VMEM bounded at any Lk (v7x safe).
# ----------------------------------------------------------------------------
def _attn_probs_kernel(*refs, n_head, d_k, has_bias):
    if has_bias:
        q_ref, k_ref, bias_ref, lse_ref, attn_ref = refs
    else:
        q_ref, k_ref, lse_ref, attn_ref = refs
        bias_ref = None

    qv = q_ref[0]                       # (tq, H*d_k) bf16
    kv = k_ref[0]                       # (tk, H*d_k) bf16
    bias = bias_ref[0].astype(jnp.float32) if has_bias else None

    for h in range(n_head):
        s = lax.dot_general(qv[:, h * d_k:(h + 1) * d_k],
                            kv[:, h * d_k:(h + 1) * d_k],
                            (((1,), (1,)), ((), ())),
                            preferred_element_type=jnp.float32)     # (tq, tk)
        if has_bias:
            s = s + bias
        attn_ref[0, h] = jnp.exp(s - lse_ref[0, h]).astype(attn_ref.dtype)


def attention_probs(q_arr, k_arr, lse, *, n_head, d_k,
                    q_col=0, k_col=0, bias=None, tq=256, tk=512):
    """Returns attn (B, H, Lq, Lk) = softmax(QK^T + bias) using the flash LSE."""
    B, Lq, _ = q_arr.shape
    Lk = k_arr.shape[1]
    tq = _fit(Lq, tq, 8)
    tk = _fit(Lk, tk, 128)
    has_bias = bias is not None

    in_specs = [
        pl.BlockSpec((1, tq, n_head * d_k), lambda b, qi, ki, c=q_col: (b, qi, c)),
        pl.BlockSpec((1, tk, n_head * d_k), lambda b, qi, ki, c=k_col: (b, ki, c)),
    ]
    args = [q_arr, k_arr]
    if has_bias:
        if bias.shape[0] == 1:
            in_specs.append(pl.BlockSpec((1, tq, tk), lambda b, qi, ki: (0, qi, ki)))
        else:
            in_specs.append(pl.BlockSpec((1, tq, tk), lambda b, qi, ki: (b, qi, ki)))
        args.append(bias)
    in_specs.append(pl.BlockSpec((1, n_head, tq, 1), lambda b, qi, ki: (b, 0, qi, 0)))
    args.append(lse)

    kernel = functools.partial(_attn_probs_kernel, n_head=n_head, d_k=d_k,
                               has_bias=has_bias)
    # attn kept fp32 for numerical parity with the reference module; switch the
    # out_shape dtype to bf16 to halve the O(B*H*L^2) writeback if parity allows.
    return pl.pallas_call(
        kernel,
        out_shape=jax.ShapeDtypeStruct((B, n_head, Lq, Lk), jnp.float32),
        grid=(B, Lq // tq, Lk // tk),
        in_specs=in_specs,
        out_specs=pl.BlockSpec((1, n_head, tq, tk), lambda b, qi, ki: (b, 0, qi, ki)),
        compiler_params=pltpu.CompilerParams(
            dimension_semantics=("parallel", "parallel", "parallel"),
            vmem_limit_bytes=_VMEM_LIMIT,
        ),
    )(*args)


# ----------------------------------------------------------------------------
# Kernel 4: tiled output projection fused with residual add (fp32 output)
# ----------------------------------------------------------------------------
def _fc_residual_kernel(x_ref, w_ref, res_ref, o_ref, acc_ref):
    @pl.when(pl.program_id(2) == 0)
    def _():
        acc_ref[...] = jnp.zeros_like(acc_ref)

    acc_ref[...] += jnp.dot(
        x_ref[...].astype(jnp.bfloat16),
        w_ref[...].astype(jnp.bfloat16),
        preferred_element_type=jnp.float32,
    )

    @pl.when(pl.program_id(2) == pl.num_programs(2) - 1)
    def _():
        o_ref[...] = (acc_ref[...] + res_ref[...].astype(jnp.float32)).astype(o_ref.dtype)


def fc_residual(x, w, residual, *, tm=512, tn=512, tk=512):
    M, K = x.shape
    K2, N = w.shape
    assert K == K2
    tm, tn, tk = _fit(M, tm, 8), _fit(N, tn, 128), _fit(K, tk, 128)
    return pl.pallas_call(
        _fc_residual_kernel,
        out_shape=jax.ShapeDtypeStruct((M, N), jnp.float32),
        grid=(M // tm, N // tn, K // tk),
        in_specs=[
            pl.BlockSpec((tm, tk), lambda i, j, l: (i, l)),
            pl.BlockSpec((tk, tn), lambda i, j, l: (l, j)),
            pl.BlockSpec((tm, tn), lambda i, j, l: (i, j)),
        ],
        out_specs=pl.BlockSpec((tm, tn), lambda i, j, l: (i, j)),
        scratch_shapes=[pltpu.VMEM((tm, tn), jnp.float32)],
        compiler_params=pltpu.CompilerParams(
            dimension_semantics=("parallel", "parallel", "arbitrary"),
            vmem_limit_bytes=_VMEM_LIMIT,
        ),
    )(x, w, residual)


# ----------------------------------------------------------------------------
# Module wrapper (glue in plain JAX: free reshapes / parameter setup)
# ----------------------------------------------------------------------------
def init_params(key, n_head, d_model, d_k, d_v):
    """Weights stored bf16, pre-transposed to (in_features, out_features), with the
    module's 1/sqrt(d_k) temperature folded into W_q.  w_qkv = W_q | W_k | W_v."""
    k1, k2, k3, k4 = jax.random.split(key, 4)
    s = 0.02
    scale = 1.0 / (float(d_k) ** 0.5)
    w_qs = (s * scale) * jax.random.normal(k1, (d_model, n_head * d_k), jnp.float32)
    w_ks = s * jax.random.normal(k2, (d_model, n_head * d_k), jnp.float32)
    w_vs = s * jax.random.normal(k3, (d_model, n_head * d_v), jnp.float32)
    fc = s * jax.random.normal(k4, (n_head * d_v, d_model), jnp.float32)
    p = {
        "w_qs": w_qs.astype(jnp.bfloat16),
        "w_ks": w_ks.astype(jnp.bfloat16),
        "w_vs": w_vs.astype(jnp.bfloat16),
        "fc": fc.astype(jnp.bfloat16),
    }
    p["w_qkv"] = jnp.concatenate([p["w_qs"], p["w_ks"], p["w_vs"]], axis=1)
    return p


def _mask_to_bias(mask, B, Lq, Lk):
    """Additive 0 / -1e9 bf16 bias; kept batch-size-1 when the mask is shared.
    Mask polarity matches the module: True/nonzero == masked."""
    m = jnp.asarray(mask)
    if m.ndim == 4:          # (B, 1, Lq, Lk)
        m = m[:, 0]
    if m.ndim == 2:          # (Lq, Lk)
        m = m[None]
    Bb = m.shape[0]
    m = jnp.broadcast_to(m != 0, (Bb, Lq, Lk))
    return jnp.where(m, -1e9, 0.0).astype(jnp.bfloat16)


def multi_head_attention(params, q, k, v, n_head, d_k, d_v,
                         mask=None, return_attn=True):
    """q,k,v: (B, L, d_model) fp32.  Returns (output (B,Lq,d_model) fp32, attn or None)."""
    B, Lq, d_model = q.shape
    Lk = k.shape[1]
    Lv = v.shape[1]
    residual = q.reshape(B * Lq, d_model)

    # ---- input projections (Linear, bias=False), bf16 out; fused for self-attn.
    # The fused output is consumed in place via column-block index_maps (no slices).
    fuse = (q is k) and (k is v) and (d_k == d_v) and ((n_head * d_k) % 128 == 0)
    if fuse:
        qkv = matmul_bf16(q.reshape(B * Lq, d_model), params["w_qkv"])
        qkv = qkv.reshape(B, Lq, 3 * n_head * d_k)
        q_arr = k_arr = v_arr = qkv
        q_col, k_col, v_col = 0, 1, 2
    else:
        q_arr = matmul_bf16(q.reshape(B * Lq, d_model), params["w_qs"]).reshape(
            B, Lq, n_head * d_k)
        k_arr = matmul_bf16(k.reshape(B * Lk, d_model), params["w_ks"]).reshape(
            B, Lk, n_head * d_k)
        v_arr = matmul_bf16(v.reshape(B * Lv, d_model), params["w_vs"]).reshape(
            B, Lv, n_head * d_v)
        q_col = k_col = v_col = 0

    bias = _mask_to_bias(mask, B, Lq, Lk) if mask is not None else None

    # ---- flash attention (always; VMEM bounded at any Lk) -> ctx + per-head LSE
    ctx, lse = flash_attention(q_arr, k_arr, v_arr, n_head=n_head, d_k=d_k, d_v=d_v,
                               q_col=q_col, k_col=k_col, v_col=v_col, bias=bias)

    attn = None
    if return_attn:
        attn = attention_probs(q_arr, k_arr, lse, n_head=n_head, d_k=d_k,
                               q_col=q_col, k_col=k_col, bias=bias)

    # ctx is already lane-dense (B, Lq, H*d_v): no transpose needed.
    # fc + residual; dropout layers are identity in eval mode.
    # TODO(synk): train-mode dropout (attn + output) not implemented.
    # TODO(synk): module's self.layer_norm is declared but unused in forward(), so not applied.
    out = fc_residual(ctx.reshape(B * Lq, n_head * d_v), params["fc"], residual)
    return out.reshape(B, Lq, d_model), attn


# ----------------------------------------------------------------------------
# Pure-jnp reference (same math / same bf16-stored weights) for a sanity check
# ----------------------------------------------------------------------------
def reference_forward(params, q, k, v, n_head, d_k, d_v, mask=None):
    B, Lq, d_model = q.shape
    Lk = k.shape[1]
    hi = lax.Precision.HIGHEST
    w_qs = params["w_qs"].astype(jnp.float32)   # scale already folded in
    w_ks = params["w_ks"].astype(jnp.float32)
    w_vs = params["w_vs"].astype(jnp.float32)
    w_fc = params["fc"].astype(jnp.float32)
    qp = jnp.einsum("bld,dn->bln", q, w_qs, precision=hi).reshape(
        B, Lq, n_head, d_k).transpose(0, 2, 1, 3)
    kp = jnp.einsum("bld,dn->bln", k, w_ks, precision=hi).reshape(
        B, Lk, n_head, d_k).transpose(0, 2, 1, 3)
    vp = jnp.einsum("bld,dn->bln", v, w_vs, precision=hi).reshape(
        B, Lk, n_head, d_v).transpose(0, 2, 1, 3)
    s = jnp.einsum("bhqd,bhkd->bhqk", qp, kp, precision=hi)
    if mask is not None:
        m = jnp.asarray(mask)
        if m.ndim == 2:
            m = m[None, None]
        elif m.ndim == 3:
            m = m[:, None]
        s = jnp.where(m != 0, -1e9, s)
    attn = jax.nn.softmax(s, axis=-1)
    ctx = jnp.einsum("bhqk,bhkd->bhqd", attn, vp, precision=hi)
    ctx = ctx.transpose(0, 2, 1, 3).reshape(B, Lq, n_head * d_v)
    out = jnp.einsum("blc,cd->bld", ctx, w_fc, precision=hi) + q
    return out, attn


# ----------------------------------------------------------------------------
if __name__ == "__main__":
    # Small but lane-friendly shapes implied by multi-head attention.
    B, L, d_model = 2, 128, 256
    n_head, d_k, d_v = 4, 64, 64

    key = jax.random.PRNGKey(0)
    kx, kp = jax.random.split(key, 2)
    x = jax.random.normal(kx, (B, L, d_model), jnp.float32)
    params = init_params(kp, n_head, d_model, d_k, d_v)

    # Causal boolean mask, True == masked (matches `masked_fill(mask == True, -1e9)`).
    causal = jnp.triu(jnp.ones((L, L), dtype=jnp.bool_), k=1)

    # Path 1: self-attention, no mask (fused QKV projection).
    out, attn = multi_head_attention(params, x, x, x, n_head, d_k, d_v,
                                     mask=None, return_attn=True)
    # Path 2: self-attention with a shared causal mask (additive-bias path).
    out_m, attn_m = multi_head_attention(params, x, x, x, n_head, d_k, d_v,
                                         mask=causal, return_attn=True)
    jax.block_until_ready((out, attn, out_m, attn_m))

    assert out.shape == (B, L, d_model) and attn.shape == (B, n_head, L, L)
    assert out_m.shape == (B, L, d_model) and attn_m.shape == (B, n_head, L, L)

    # Sanity check against a pure-jnp reference (same bf16 weights, fp32 math).
    ref_out, ref_attn = reference_forward(params, x, x, x, n_head, d_k, d_v, mask=None)
    ref_out_m, ref_attn_m = reference_forward(params, x, x, x, n_head, d_k, d_v,
                                              mask=causal)
    assert jnp.allclose(out, ref_out, atol=5e-2, rtol=5e-2)
    assert jnp.allclose(attn, ref_attn, atol=2e-2)
    assert jnp.allclose(out_m, ref_out_m, atol=5e-2, rtol=5e-2)
    assert jnp.allclose(attn_m, ref_attn_m, atol=2e-2)

    print("KERNEL_OK")
</pallas_src>

<mosaic_0001>
module attributes {stable_mosaic.version = 11 : i64} {
  func.func @_matmul_kernel(%arg0: i32, %arg1: i32, %arg2: i32, %arg3: memref<256x256xf32, #tpu.memory_space<vmem>>, %arg4: memref<256x384xbf16, #tpu.memory_space<vmem>>, %arg5: memref<256x384xbf16, #tpu.memory_space<vmem>>, %arg6: memref<256x384xf32, #tpu.memory_space<vmem>>) attributes {dimension_semantics = [#tpu.dimension_semantics<parallel>, #tpu.dimension_semantics<parallel>, #tpu.dimension_semantics<arbitrary>], iteration_bounds = array<i64: 1, 2, 1>, scalar_prefetch = 0 : i64, scratch_operands = 1 : i64, tpu.core_type = #tpu.core_type<tc>, window_params = [{transform_indices = @transform_0, window_bounds = array<i64: 256, 256>}, {transform_indices = @transform_1, window_bounds = array<i64: 256, 384>}, {transform_indices = @transform_2, window_bounds = array<i64: 256, 384>}]} {
    %c0_i32 = arith.constant 0 : i32
    %0 = arith.cmpi eq, %arg2, %c0_i32 : i32
    %1 = arith.extui %0 : i1 to i32
    %c0_i32_0 = arith.constant 0 : i32
    %2 = arith.cmpi ne, %1, %c0_i32_0 : i32
    scf.if %2 {
      %cst_10 = arith.constant 0.000000e+00 : f32
      %13 = vector.broadcast %cst_10 : f32 to vector<256x384xf32>
      %c0_11 = arith.constant 0 : index
      %c0_12 = arith.constant 0 : index
      %14 = vector.load %arg6[%c0_11, %c0_12] : memref<256x384xf32, #tpu.memory_space<vmem>>, vector<256x384xf32>
      tpu.vector_store %arg6[%c0_11, %c0_12], %13 {strides = array<i32>} : memref<256x384xf32, #tpu.memory_space<vmem>>, vector<256x384xf32>,
    } else {
    }
    %c0 = arith.constant 0 : index
    %c0_1 = arith.constant 0 : index
    %3 = vector.load %arg6[%c0, %c0_1] : memref<256x384xf32, #tpu.memory_space<vmem>>, vector<256x384xf32>
    %c0_2 = arith.constant 0 : index
    %c0_3 = arith.constant 0 : index
    %4 = vector.load %arg3[%c0_2, %c0_3] : memref<256x256xf32, #tpu.memory_space<vmem>>, vector<256x256xf32>
    %5 = arith.truncf %4 : vector<256x256xf32> to vector<256x256xbf16>
    %c0_4 = arith.constant 0 : index
    %c0_5 = arith.constant 0 : index
    %6 = vector.load %arg4[%c0_4, %c0_5] : memref<256x384xbf16, #tpu.memory_space<vmem>>, vector<256x384xbf16>
    %cst = arith.constant dense<0.000000e+00> : vector<256x384xf32>
    %7 = tpu.matmul %5, %6, %cst {dimension_numbers = #tpu.dot_dimension_numbers<[1], [0], [0], [1], [0, 0, 1, 1], [], []>} : vector<256x256xbf16>, vector<256x384xbf16>, vector<256x384xf32> -> vector<256x384xf32>
    %8 = arith.addf %3, %7 : vector<256x384xf32>
    %c0_6 = arith.constant 0 : index
    %c0_7 = arith.constant 0 : index
    %9 = vector.load %arg6[%c0_6, %c0_7] : memref<256x384xf32, #tpu.memory_space<vmem>>, vector<256x384xf32>
    tpu.vector_store %arg6[%c0_6, %c0_7], %8 {strides = array<i32>} : memref<256x384xf32, #tpu.memory_space<vmem>>, vector<256x384xf32>,
    %c0_i32_8 = arith.constant 0 : i32
    %10 = arith.cmpi eq, %arg2, %c0_i32_8 : i32
    %11 = arith.extui %10 : i1 to i32
    %c0_i32_9 = arith.constant 0 : i32
    %12 = arith.cmpi ne, %11, %c0_i32_9 : i32
    scf.if %12 {
      %c0_10 = arith.constant 0 : index
      %c0_11 = arith.constant 0 : index
      %13 = vector.load %arg6[%c0_10, %c0_11] : memref<256x384xf32, #tpu.memory_space<vmem>>, vector<256x384xf32>
      %14 = arith.truncf %13 : vector<256x384xf32> to vector<256x384xbf16>
      %c0_12 = arith.constant 0 : index
      %c0_13 = arith.constant 0 : index
      %15 = vector.load %arg5[%c0_12, %c0_13] : memref<256x384xbf16, #tpu.memory_space<vmem>>, vector<256x384xbf16>
      tpu.vector_store %arg5[%c0_12, %c0_13], %14 {strides = array<i32>} : memref<256x384xbf16, #tpu.memory_space<vmem>>, vector<256x384xbf16>,
    } else {
    }
    return
  }
  func.func @transform_0(%arg0: i32, %arg1: i32, %arg2: i32) -> (i32, i32) {
    %c0_i32 = arith.constant 0 : i32
    return %arg0, %arg2 : i32, i32
  }
  func.func @transform_1(%arg0: i32, %arg1: i32, %arg2: i32) -> (i32, i32) {
    %c0_i32 = arith.constant 0 : i32
    return %arg2, %arg1 : i32, i32
  }
  func.func @transform_2(%arg0: i32, %arg1: i32, %arg2: i32) -> (i32, i32) {
    %c0_i32 = arith.constant 0 : i32
    return %arg0, %arg1 : i32, i32
  }
}

</mosaic_0001>

<bundles_post_ra>
// kernel: tpu_custom_call.1
= control target key start
LH: loop header
LB: loop body
LE: loop exit
PB: predicated region body
PF: predicated region fallthrough
CT: control target
= control target key end

     0   :  { %7 = vsyncpa [#allocation4], 0  ;;  %s2957_s0 = inlined_call_operand.hbm [shape: f32[256,256], index: 0, kind: input, shape index: {}]   ;;  %s2958_s1 = inlined_call_operand.hbm [shape: bf16[256,768], index: 1, kind: input, shape index: {}]   ;;  %s2959_s2 = inlined_call_operand.hbm [shape: bf16[256,768], index: 2, kind: output, shape index: {}]  }
   0x1   :  { %8 = vsyncpa [#allocation7], 0 }
   0x2   :  { %10 = vsyncpa [#allocation7 + $0x1], 0 }
   0x3   :  { %11 = vsyncpa [#allocation5], 0 }
   0x4   :  { %13 = vsyncpa [#allocation5 + $0x1], 0  ;;  %s2608_s9 = smov 0   ;;  %s2610_s10 = smov 0  }
   0x5   :  { %s2612_s11 = smov 0   ;;  %s2614_s12 = smov 0  }
   0x6   :  { %s2616_s13 = smov 0   ;;  %s2618_s14 = smov 0  }
   0x7 LB: > { %s1988_s15 = sadd.s32 4294967295, %s2580_s14   ;;  %s1989_s16 = sadd.s32 4294967294, %s2580_s14   ;;  %s2580_s14 = sphi %s2618_s14, %s19_s14   ;;  %s2576_s13 = sphi %s2616_s13, %s2987_s13   ;;  %s2572_s12 = sphi %s2614_s12, %s2986_s12   ;;  %s2568_s11 = sphi %s2612_s11, %s2985_s11   ;;  %s2564_s10 = sphi %s2610_s10, %s2984_s10   ;;  %s2560_s9 = sphi %s2608_s9, %s2983_s9  }
   0x8   : > { %s75_s17 = sadd.s32 1, %s2568_s11  ;;  %p82_p0 = scmp.ne.s32.totalorder %s2568_s11, %s2564_s10 }
   0x9   : > { %p83_p1 = scmp.eq.s32.totalorder %s2580_s14, 0  ;;  %p88_p2 = scmp.ne.s32.totalorder %s2564_s10, %s2560_s9 }
   0xa   : > { %p2646_p3 = scmp.eq.s32.totalorder %s1988_s15, 0  ;;  %p114_p4 = scmp.eq.s32.totalorder %s1988_s15, 1 }
   0xb   : > { %p2650_p5 = por %p83_p1, %p82_p0  ;;  %p120_p6 = scmp.eq.s32.totalorder %s1989_s16, 1 }
   0xc   : > { %s2966_s18 = scalar_select %p2646_p3, 1, 0 }
   0xd   : > { %p2656_p7 = por %p2646_p3, %p88_p2  ;;  %p2660_p8 = por %p114_p4, %p82_p0 }
   0xe   : > { %p2664_p9 = por %p120_p6, %p88_p2  ;;  %p1990_p10 = scmp.ge.s32.totalorder %s2580_s14, 1 }
   0xf   : > { %s2968_s20 = scalar_select %p2656_p7, 1, 0 }
  0x10   : > { %s2969_s21 = scalar_select %p2660_p8, 1, 0 }
  0x11   : > { %s2970_s22 = scalar_select %p2664_p9, 1, 0 }
  0x12   : > { %p127_p11 = scmp.lt.s32.totalorder %s2580_s14, 3  ;;  %s2582_s24 = smov [#allocation3]  }
  0x13   : > { %s145_s25 = sshll.u32 %s2582_s24, 4  ;;  %p2312_p1 = scmp.lt.s32.totalorder %s2580_s14, 2  ;;  %s2674_s25 = int_to_ptr.vmem [resolvable:$true] %s145_s25 }
  0x14   : > { %p2670_p12 = pnand %p1990_p10, %p127_p11  ;;  %s34_s28 = sadd.s32 1, %s2576_s13 }
  0x15   : > { %p2688_p4 = pnand %p2312_p1, %p2650_p5  ;;  %p2693_p6 = scmp.ge.s32.totalorder %s34_s28, 2 }
  0x16   : > { %s2971_s23 = scalar_select %p2670_p12, 1, 0 }
  0x17   : > { %p2299_p13 = pneg %p2670_p12  ;;  %s2436_s4 = scalar_lea.hbm %s2957_s0, 8192 }
  0x18   : > { %s2973_s27 = scalar_select %p2688_p4, 1, 0 }
  0x19   : > { %p2682_p2 = pnand %p2299_p13, %p2646_p3  ;;  %p2437_p10 = scmp.ne.s32.totalorder %s2957_s0, %s2436_s4 }
  0x1a   : > { %s2974_s29 = scalar_select %p2693_p6, 1, 0 }
  0x1b   : > { %p2438_p11 = pneg %p2682_p2  ;;  %p2443_p1 = scmp.lt.u32.totalorder %s2436_s4, %s2957_s0 }
  0x1d   : > { %p2439_p13 = pnand %p2438_p11, %p2437_p10 }
  0x1f   : > { %p2440_p5 = pneg %p2439_p13 }
  0x21   : > { %p2445_p0 = pnand %p2443_p1, %p2440_p5 }
  0x23   : > { %2448 = shalt.err (!%p2445_p0)
}
  0x24   : > { %s2449_s15 = scalar_lea.vmem %s2674_s25, 8192  ;;  %p2457_p3 = scmp.lt.s32.totalorder %s2674_s25, %s2674_s25 }
  0x25   : > { %p2450_p9 = scmp.ne.s32.totalorder %s2674_s25, %s2449_s15  ;;  %p2458_p12 = scmp.lt.s32.totalorder %s2449_s15, %s2449_s15 }
  0x27   : > { %p2452_p8 = pnand %p2450_p9, %p2438_p11  ;;  %p2459_p4 = por %p2458_p12, %p2457_p3 }
  0x29   : > { %p2453_p7 = pneg %p2452_p8 }
  0x2b   : > { %p2460_p6 = pnand %p2459_p4, %p2453_p7 }
  0x2d   : > { %2463 = shalt.err (!%p2460_p6)
}
  0x2e   : > { %s2583_s16 = smov 256   ;;  %s2584_s19 = smov 16  }
  0x2f   : > { %2302 = dma.hbm_to_vmem [thread:$0]  (!%p2682_p2), %s2957_s0, 8192, %s2674_s25, [#allocation4], %s2583_s16, %s2583_s16, %s2584_s19  }
  0x30   : > { %s159_s3 = sand.u32 1, %s2568_s11   ;;  %p2975_p3 = scmp.ne.s32.totalorder %s2974_s29, 0 }
  0x31   : > { %s2289_s4 = smul.u32 384, %s159_s3  ;;  %s2738_s16 = scalar_lea.sflag [#allocation7], %s159_s3 }
  0x32   : > { %s2989_s28 = smov (%p2975_p3, %s34_s28), 0  ;;  %s2111_s6 = smul.u32 192, %s2576_s13 }
  0x33   : > { %s71_s5 = ssub.s32 %s2576_s13, %s2989_s28  ;;  %s163_s25 = scalar_lea.vmem [#allocation6], %s2289_s4 }
  0x34   : > { %p73_p7 = scmp.eq.s32.totalorder %s71_s5, 0  ;;  %s2729_s15 = scalar_lea.hbm %s2958_s1, %s2111_s6 }
  0x35   : > { %s173_s26 = sshll.u32 %s163_s25, 4  ;;  %s2464_s19 = scalar_lea.hbm %s2729_s15, 6144  ;;  %s2736_s26 = int_to_ptr.vmem [resolvable:$true] %s173_s26 }
  0x36   : > { %s2734_s29 = scalar_select %p73_p7, %s2568_s11, %s75_s17  }
  0x37   : > { %p2465_p8 = scmp.ne.s32.totalorder %s2729_s15, %s2464_s19  ;;  %p2976_p9 = scmp.ne.s32.totalorder %s2973_s27, 0 }
  0x38   : > { %s2469_s4 = scalar_lea.hbm %s2958_s1, 12288  ;;  %p2470_p4 = scmp.lt.u32.totalorder %s2729_s15, %s2958_s1 }
  0x39   : > { %p2466_p12 = pneg %p2976_p9  ;;  %p2471_p6 = scmp.lt.u32.totalorder %s2469_s4, %s2464_s19 }
  0x3a   : > { %p2473_p11 = scmp.lt.u32.totalorder %s2464_s19, %s2729_s15 }
  0x3b   : > { %p2467_p0 = pnand %p2466_p12, %p2465_p8  ;;  %p2472_p10 = por %p2471_p6, %p2470_p4 }
  0x3d   : > { %p2468_p2 = pneg %p2467_p0  ;;  %p2474_p13 = por %p2473_p11, %p2472_p10 }
  0x3f   : > { %p2475_p5 = pnand %p2474_p13, %p2468_p2 }
  0x41   : > { %2478 = shalt.err (!%p2475_p5)
}
  0x42   : > { %s2479_s17 = scalar_lea.vmem %s2736_s26, 6144  ;;  %s2585_s3 = smov [#allocation6]  }
  0x43   : > { %p2480_p1 = scmp.ne.s32.totalorder %s2736_s26, %s2479_s17  ;;  %s2484_s7 = sshll.u32 %s2585_s3, 4  ;;  %s2485_s7 = int_to_ptr.vmem [resolvable:$false] %s2484_s7 }
  0x44   : > { %s2486_s8 = scalar_lea.vmem %s2485_s7, 12288  ;;  %p2487_p8 = scmp.lt.s32.totalorder %s2736_s26, %s2485_s7 }
  0x45   : > { %p2482_p3 = pnand %p2480_p1, %p2466_p12  ;;  %p2488_p0 = scmp.lt.s32.totalorder %s2486_s8, %s2479_s17 }
  0x47   : > { %p2483_p7 = pneg %p2482_p3  ;;  %p2489_p4 = por %p2488_p0, %p2487_p8 }
  0x49   : > { %p2490_p6 = pnand %p2489_p4, %p2483_p7 }
  0x4b   : > { %2493 = shalt.err (!%p2490_p6)
}
  0x4c   : > { %s2586_s25 = smov 384   ;;  %s2587_s19 = smov 192  }
  0x4d   : > { %s2588_s24 = smov 12   ;;  %p2977_p12 = scmp.ne.s32.totalorder %s2971_s23, 0 }
  0x4e   : > { %2306 = dma.hbm_to_vmem [thread:$0]  (!%p2976_p9), %s2729_s15, 6144, %s2736_s26, %s2738_s16, %s2586_s25, %s2587_s19, %s2588_s24  }
  0x4f   : > { %185 = sbr.rel (%p2977_p12) target bundleno = 510 (0x1fe), region = 28  ;;  %p2978_p2 = scmp.ne.s32.totalorder (!%p2977_p12), %s2966_s18, 0 }
  0x56   : > { %2547 = dma.done.wait (%p2978_p2), [#allocation4], 8192  }
  0x57   : > { %2549 = vsyncadd (%p2978_p2), [#allocation4], 4294959104  ;;  %s2773_s30 = sand.u32 1, %s2564_s10   ;;  %p2979_p9 = scmp.ne.s32.totalorder %s2968_s20, 0 }
  0x58   : > { %s2290_s4 = smul.u32 384, %s2773_s30  ;;  %s192_s5 = scalar_lea.sflag [#allocation7], %s2773_s30 }
  0x5a   : > { %s2779_s27 = scalar_lea.vmem [#allocation6], %s2290_s4 }
  0x5b   : > { %2551 = dma.done.wait (%p2979_p9), %s192_s5, 6144  }
  0x5c   : > { %2553 = vsyncadd (%p2979_p9), %s192_s5, 4294961152  ;;  %v2372_v0 = vld [vmem:[%s2779_s27 + $0x4] ss:$12 sps:$4 sm:$0xff]   ;;  %v2374_v1 = vld [vmem:[%s2779_s27] ss:$12 sps:$4 sm:$0xff]   ;;  %s2835_s18 = scalar_lea.vmem [#allocation8], %s2290_s4 }
  0x5d   : > { %835 = vmatprep.subr.bf16.mxu0 %v2372_v0  ;;  %v2375_v2 = vld [vmem:[%s2779_s27 + $0x1c] ss:$12 sps:$4 sm:$0xff]   ;;  %v2377_v3 = vld [vmem:[%s2779_s27 + $0x18] ss:$12 sps:$4 sm:$0xff]   ;;  %v2378_v4 = vld [vmem:[%s2779_s27 + $0x34] ss:$12 sps:$4 sm:$0xff]  }
  0x5e   : > { %836 = vmatpush1.bf16.msra.mxu0 %v2374_v1  ;;  %v2380_v5 = vld [vmem:[%s2779_s27 + $0x30] ss:$12 sps:$4 sm:$0xff]   ;;  %v2381_v6 = vld [vmem:[%s2779_s27 + $0x4c] ss:$12 sps:$4 sm:$0xff]   ;;  %v2393_v7 = vld [vmem:[%s2779_s27 + $0xc8] ss:$12 sps:$4 sm:$0xff]  }
  0x5f   : > { %837 = vmatprep.subr.bf16.mxu0 %v2375_v2  ;;  %v2383_v8 = vld [vmem:[%s2779_s27 + $0x48] ss:$12 sps:$4 sm:$0xff]   ;;  %v2384_v9 = vld [vmem:[%s2779_s27 + $0x64] ss:$12 sps:$4 sm:$0xff]   ;;  %2177 = vmatprep.subr.bf16.mxu1 %v2393_v7  ;;  %v2398_v11 = vld [vmem:[%s2779_s27 + $0xe0] ss:$12 sps:$4 sm:$0xff]  }
  0x60   : > { %v2396_v10 = vld [vmem:[%s2779_s27 + $0x8] ss:$12 sps:$4 sm:$0xff]   ;;  %v2386_v12 = vld [vmem:[%s2779_s27 + $0x60] ss:$12 sps:$4 sm:$0xff]   ;;  %v2403_v15 = vld [vmem:[%s2779_s27 + $0xf8] ss:$12 sps:$4 sm:$0xff]  }
  0x61   : > { %2178 = vmatpush3.bf16.msra.mxu1 %v2396_v10  ;;  %v2387_v13 = vld [vmem:[%s2779_s27 + $0x7c] ss:$12 sps:$4 sm:$0xff]   ;;  %v2401_v14 = vld [vmem:[%s2779_s27 + $0x20] ss:$12 sps:$4 sm:$0xff]   ;;  %v2389_v16 = vld [vmem:[%s2779_s27 + $0x78] ss:$12 sps:$4 sm:$0xff]  }
  0x62   : > { %838 = vmatpush1.bf16.msra.mxu0 %v2377_v3  ;;  %2179 = vmatprep.subr.bf16.mxu1 %v2398_v11  ;;  %v2406_v17 = vld [vmem:[%s2779_s27 + $0x38] ss:$12 sps:$4 sm:$0xff]   ;;  %v2390_v18 = vld [vmem:[%s2779_s27 + $0x94] ss:$12 sps:$4 sm:$0xff]   ;;  %v2408_v19 = vld [vmem:[%s2779_s27 + $0x110] ss:$12 sps:$4 sm:$0xff]  }
  0x63   : > { %839 = vmatprep.subr.bf16.mxu0 %v2378_v4  ;;  %v2392_v20 = vld [vmem:[%s2779_s27 + $0x90] ss:$12 sps:$4 sm:$0xff]   ;;  %v2413_v22 = vld [vmem:[%s2779_s27 + $0x128] ss:$12 sps:$4 sm:$0xff]   ;;  %v2394_v23 = vld [vmem:[%s2779_s27 + $0xac] ss:$12 sps:$4 sm:$0xff]  }
  0x64   : > { %v2411_v21 = vld [vmem:[%s2779_s27 + $0x50] ss:$12 sps:$4 sm:$0xff]   ;;  %v2397_v24 = vld [vmem:[%s2779_s27 + $0xa8] ss:$12 sps:$4 sm:$0xff]   ;;  %v2418_v26 = vld [vmem:[%s2779_s27 + $0x140] ss:$12 sps:$4 sm:$0xff]  }
  0x65   : > { %2180 = vmatpush3.bf16.msra.mxu1 %v2401_v14  ;;  %v2416_v25 = vld [vmem:[%s2779_s27 + $0x68] ss:$12 sps:$4 sm:$0xff]   ;;  %v2399_v27 = vld [vmem:[%s2779_s27 + $0xc4] ss:$12 sps:$4 sm:$0xff]   ;;  %v2402_v28 = vld [vmem:[%s2779_s27 + $0xc0] ss:$12 sps:$4 sm:$0xff]  }
  0x66   : > { %840 = vmatpush1.bf16.msra.mxu0 %v2380_v5  ;;  %2181 = vmatprep.subr.bf16.mxu1 %v2403_v15  ;;  %v2421_v29 = vld [vmem:[%s2779_s27 + $0x80] ss:$12 sps:$4 sm:$0xff]   ;;  %v2423_v30 = vld [vmem:[%s2779_s27 + $0x158] ss:$12 sps:$4 sm:$0xff]   ;;  %v2404_v31 = vld [vmem:[%s2779_s27 + $0xdc] ss:$12 sps:$4 sm:$0xff]  }
  0x67   : > { %841 = vmatprep.subr.bf16.mxu0 %v2381_v6  ;;  %v2426_v32 = vld [vmem:[%s2779_s27 + $0x98] ss:$12 sps:$4 sm:$0xff]   ;;  %v2428_v34 = vld [vmem:[%s2779_s27 + $0x170] ss:$12 sps:$4 sm:$0xff]   ;;  %v2409_v35 = vld [vmem:[%s2779_s27 + $0xf4] ss:$12 sps:$4 sm:$0xff]  }
  0x68   : > { %v2407_v33 = vld [vmem:[%s2779_s27 + $0xd8] ss:$12 sps:$4 sm:$0xff]   ;;  %v420_v36 = vld [vmem:[#allocation3 + $0x8] sm:$0xff]  ;;  %v2431_v39 = vld [vmem:[%s2779_s27 + $0xb0] ss:$12 sps:$4 sm:$0xff]   ;;  %s2176_s20 = smul.u32 192, %s2572_s12 }
  0x69   : > { %2182 = vmatpush3.bf16.msra.mxu1 %v2406_v17  ;;  %v422_v37 = vld [vmem:[#allocation3 + $0x18] sm:$0xff]  ;;  %v419_v40 = vld [vmem:[#allocation3] sm:$0xff]  ;;  %v421_v41 = vld [vmem:[#allocation3 + $0x10] sm:$0xff]  ;;  %s1881_s23 = sshll.u32 %s2835_s18, 4  ;;  %s1865_s12 = scalar_lea.sflag [#allocation5], %s2773_s30  ;;  %s2906_s23 = int_to_ptr.vmem [resolvable:$true] %s1881_s23 }
  0x6a   : > { %842 = vmatpush1.bf16.msra.mxu0 %v2383_v8  ;;  %2183 = vmatprep.subr.bf16.mxu1 %v2408_v19  ;;  %v484_v38 = vpack.c.bf16 %v422_v37, %v420_v36  ;;  %v2412_v42 = vld [vmem:[%s2779_s27 + $0xf0] ss:$12 sps:$4 sm:$0xff]   ;;  %v424_v43 = vld [vmem:[#allocation3 + $0x28] sm:$0xff]  ;;  %v483_v46 = vpack.c.bf16 %v421_v41, %v419_v40  ;;  %v423_v50 = vld [vmem:[#allocation3 + $0x20] sm:$0xff]  ;;  %s2904_s16 = scalar_lea.hbm %s2959_s2, %s2176_s20  ;;  %s2494_s6 = scalar_lea.vmem %s2906_s23, 6144 }
  0x6b   : > { %843 = vmatprep.subr.bf16.mxu0 %v2384_v9  ;;  %v426_v44 = vld [vmem:[#allocation3 + $0x38] sm:$0xff]  ;;  %v2417_v48 = vld [vmem:[%s2779_s27 + $0x108] ss:$12 sps:$4 sm:$0xff]   ;;  %v2419_v49 = vld [vmem:[%s2779_s27 + $0x124] ss:$12 sps:$4 sm:$0xff]   ;;  %p2495_p10 = scmp.ne.s32.totalorder %s2906_s23, %s2494_s6  ;;  %p2980_p11 = scmp.ne.s32.totalorder %s2969_s21, 0 }
  0x6c   : > { %v2414_v45 = vld [vmem:[%s2779_s27 + $0x10c] ss:$12 sps:$4 sm:$0xff]   ;;  %1060 = vmatprep.mubr.bf16.mxu1 %v484_v38  ;;  %867 = vmatprep.mubr.bf16.mxu0 %v484_v38  ;;  %v486_v47 = vpack.c.bf16 %v426_v44, %v424_v43  ;;  %v425_v51 = vld [vmem:[#allocation3 + $0x30] sm:$0xff]  ;;  %v2424_v55 = vld [vmem:[%s2779_s27 + $0x13c] ss:$12 sps:$4 sm:$0xff]   ;;  %s2589_s17 = smov [#allocation8]  }
  0x6d   : > { %2184 = vmatpush3.bf16.msra.mxu1 %v2411_v21  ;;  %v2422_v52 = vld [vmem:[%s2779_s27 + $0x120] ss:$12 sps:$4 sm:$0xff]   ;;  %v430_v54 = vld [vmem:[#allocation3 + $0x58] sm:$0xff]  ;;  %v485_v56 = vpack.c.bf16 %v425_v51, %v423_v50  ;;  %v429_v61 = vld [vmem:[#allocation3 + $0x50] sm:$0xff]  ;;  %p2496_p13 = pnand %p2495_p10, %p2980_p11  ;;  %s2498_s3 = sshll.u32 %s2589_s17, 4  ;;  %s2499_s3 = int_to_ptr.vmem [resolvable:$false] %s2498_s3 }
  0x6e   : > { %844 = vmatpush1.bf16.msra.mxu0 %v2386_v12  ;;  %2185 = vmatprep.subr.bf16.mxu1 %v2413_v22  ;;  %v428_v53 = vld [vmem:[#allocation3 + $0x48] sm:$0xff]  ;;  %v2427_v58 = vld [vmem:[%s2779_s27 + $0x138] ss:$12 sps:$4 sm:$0xff]   ;;  %v2429_v59 = vld [vmem:[%s2779_s27 + $0x154] ss:$12 sps:$4 sm:$0xff]   ;;  %s2500_s7 = scalar_lea.vmem %s2499_s3, 12288  ;;  %p2501_p1 = scmp.lt.s32.totalorder %s2906_s23, %s2499_s3 }
  0x6f   : > { %845 = vmatprep.subr.bf16.mxu0 %v2387_v13  ;;  %v488_v57 = vpack.c.bf16 %v430_v54, %v428_v53  ;;  %v427_v60 = vld [vmem:[#allocation3 + $0x40] sm:$0xff]  ;;  %v2432_v62 = vld [vmem:[%s2779_s27 + $0x150] ss:$12 sps:$4 sm:$0xff]   ;;  %v432_v63 = vld [vmem:[#allocation3 + $0x68] sm:$0xff]  ;;  %p2497_p5 = pneg %p2496_p13  ;;  %p2502_p3 = scmp.lt.s32.totalorder %s2500_s7, %s2494_s6 }
  0x70   : > { %v434_v0 = vld [vmem:[#allocation3 + $0x78] sm:$0xff]  ;;  %v487_v2 = vpack.c.bf16 %v429_v61, %v427_v60  ;;  %v2435_v4 = vld [vmem:[%s2779_s27 + $0x168] ss:$12 sps:$4 sm:$0xff]   ;;  %v431_v5 = vld [vmem:[#allocation3 + $0x60] sm:$0xff] }
  0x71   : > { %2186 = vmatpush3.bf16.msra.mxu1 %v2416_v25  ;;  %v2433_v1 = vld [vmem:[%s2779_s27 + $0x16c] ss:$12 sps:$4 sm:$0xff]   ;;  %v490_v3 = vpack.c.bf16 %v434_v0, %v432_v63  ;;  %v433_v6 = vld [vmem:[#allocation3 + $0x70] sm:$0xff]  ;;  %v435_v11 = vld [vmem:[#allocation3 + $0x80] sm:$0xff]  ;;  %p2503_p7 = por %p2502_p3, %p2501_p1 }
  0x72   : > { %846 = vmatpush1.bf16.msra.mxu0 %v2389_v16  ;;  %2187 = vmatprep.subr.bf16.mxu1 %v2418_v26  ;;  %v436_v7 = vld [vmem:[#allocation3 + $0x88] sm:$0xff]  ;;  %v438_v8 = vld [vmem:[#allocation3 + $0x98] sm:$0xff]  ;;  %v489_v9 = vpack.c.bf16 %v433_v6, %v431_v5  ;;  %v437_v12 = vld [vmem:[#allocation3 + $0x90] sm:$0xff] }
  0x73   : > { %847 = vmatprep.subr.bf16.mxu0 %v2390_v18  ;;  %v492_v10 = vpack.c.bf16 %v438_v8, %v436_v7  ;;  %v440_v13 = vld [vmem:[#allocation3 + $0xa8] sm:$0xff]  ;;  %v442_v14 = vld [vmem:[#allocation3 + $0xb8] sm:$0xff]  ;;  %v491_v15 = vpack.c.bf16 %v437_v12, %v435_v11  ;;  %v439_v17 = vld [vmem:[#allocation3 + $0xa0] sm:$0xff]  ;;  %p2504_p8 = pnand %p2503_p7, %p2497_p5 }
  0x74   : > { %v494_v16 = vpack.c.bf16 %v442_v14, %v440_v13  ;;  %v441_v18 = vld [vmem:[#allocation3 + $0xb0] sm:$0xff]  ;;  %v444_v19 = vld [vmem:[#allocation3 + $0xc8] sm:$0xff]  ;;  %v450_v26 = vld [vmem:[#allocation3 + $0xf8] sm:$0xff] }
  0x75   : > { %2188 = vmatpush3.bf16.msra.mxu1 %v2421_v29  ;;  %v493_v21 = vpack.c.bf16 %v441_v18, %v439_v17  ;;  %v448_v25 = vld [vmem:[#allocation3 + $0xe8] sm:$0xff]  ;;  %v447_v29 = vld [vmem:[#allocation3 + $0xe0] sm:$0xff]  ;;  %v453_v36 = vld [vmem:[#allocation3 + $0x110] sm:$0xff] }
  0x76   : > { %848 = vmatpush1.bf16.msra.mxu0 %v2392_v20  ;;  %2189 = vmatprep.subr.bf16.mxu1 %v2423_v30  ;;  %v446_v20 = vld [vmem:[#allocation3 + $0xd8] sm:$0xff]  ;;  %v449_v30 = vld [vmem:[#allocation3 + $0xf0] sm:$0xff]  ;;  %v456_v37 = vld [vmem:[#allocation3 + $0x128] sm:$0xff] }
  0x77   : > { %849 = vmatprep.subr.bf16.mxu0 %v2394_v23  ;;  %v496_v22 = vpack.c.bf16 %v446_v20, %v444_v19  ;;  %v443_v23 = vld [vmem:[#allocation3 + $0xc0] sm:$0xff]  ;;  %v458_v38 = vld [vmem:[#allocation3 + $0x138] sm:$0xff]  ;;  %v460_v43 = vld [vmem:[#allocation3 + $0x148] sm:$0xff] }
  0x78   : > { %v502_v40 = vpack.c.bf16 %v458_v38, %v456_v37  ;;  %v455_v41 = vld [vmem:[#allocation3 + $0x120] sm:$0xff]  ;;  %v462_v44 = vld [vmem:[#allocation3 + $0x158] sm:$0xff]  ;;  %v465_v54 = vld [vmem:[#allocation3 + $0x170] sm:$0xff] }
  0x79   : > { %2190 = vmatpush3.bf16.msra.mxu1 %v2426_v32  ;;  %v454_v32 = vld [vmem:[#allocation3 + $0x118] sm:$0xff]  ;;  %v463_v53 = vld [vmem:[#allocation3 + $0x160] sm:$0xff]  ;;  %v469_v60 = vld [vmem:[#allocation3 + $0x190] sm:$0xff] }
  0x7a   : > { %850 = vmatpush1.bf16.msra.mxu0 %v2397_v24  ;;  %2191 = vmatprep.subr.bf16.mxu1 %v2428_v34  ;;  %v445_v24 = vld [vmem:[#allocation3 + $0xd0] sm:$0xff]  ;;  %v466_v50 = vld [vmem:[#allocation3 + $0x178] sm:$0xff]  ;;  %v472_v61 = vld [vmem:[#allocation3 + $0x1a8] sm:$0xff] }
  0x7b   : > { %851 = vmatprep.subr.bf16.mxu0 %v2399_v27  ;;  %v495_v27 = vpack.c.bf16 %v445_v24, %v443_v23  ;;  %v475_v7 = vld [vmem:[#allocation3 + $0x1c0] sm:$0xff]  ;;  %v477_v8 = vld [vmem:[#allocation3 + $0x1d0] sm:$0xff] }
  0x7c   : > { %v511_v11 = vpack.c.bf16 %v477_v8, %v475_v7  ;;  %v479_v13 = vld [vmem:[#allocation3 + $0x1e0] sm:$0xff]  ;;  %v481_v14 = vld [vmem:[#allocation3 + $0x1f0] sm:$0xff] }
  0x7d   : > { %2192 = vmatpush3.bf16.msra.mxu1 %v2431_v39 }
  0x7e   : > { %852 = vmatpush1.bf16.msra.mxu0 %v2402_v28  ;;  %v498_v28 = vpack.c.bf16 %v450_v26, %v448_v25 }
  0x7f   : > { %853 = vmatprep.subr.bf16.mxu0 %v2404_v31  ;;  %v452_v31 = vld [vmem:[#allocation3 + $0x108] sm:$0xff] }
  0x80   : > { %1061 = vmatmul.mubr.bf16.vlgmr.msra.gmra.mrb[0].mxu1 %v483_v46  ;;  %v500_v34 = vpack.c.bf16 %v454_v32, %v452_v31 }
  0x81   : > { %1068 = vmatprep.mubr.bf16.mxu1 %v486_v47 }
  0x82   : > { %854 = vmatpush1.bf16.msra.mxu0 %v2407_v33  ;;  %v497_v33 = vpack.c.bf16 %v449_v30, %v447_v29 }
  0x83   : > { %855 = vmatprep.subr.bf16.mxu0 %v2409_v35  ;;  %v451_v35 = vld [vmem:[#allocation3 + $0x100] sm:$0xff] }
  0x84   : > { %v499_v39 = vpack.c.bf16 %v453_v36, %v451_v35 }
  0x86   : > { %856 = vmatpush1.bf16.msra.mxu0 %v2412_v42  ;;  %v457_v42 = vld [vmem:[#allocation3 + $0x130] sm:$0xff] }
  0x87   : > { %857 = vmatprep.subr.bf16.mxu0 %v2414_v45  ;;  %v501_v45 = vpack.c.bf16 %v457_v42, %v455_v41 }
  0x88   : > { %1069 = vmatmul.mubr.bf16.gmra.mrb[4].mxu1 %v485_v56 }
  0x89   : > { %1076 = vmatprep.mubr.bf16.mxu1 %v488_v57 }
  0x8a   : > { %858 = vmatpush1.bf16.msra.mxu0 %v2417_v48  ;;  %v461_v48 = vld [vmem:[#allocation3 + $0x150] sm:$0xff] }
  0x8b   : > { %859 = vmatprep.subr.bf16.mxu0 %v2419_v49  ;;  %v464_v49 = vld [vmem:[#allocation3 + $0x168] sm:$0xff] }
  0x8e   : > { %860 = vmatpush1.bf16.msra.mxu0 %v2422_v52  ;;  %v506_v52 = vpack.c.bf16 %v466_v50, %v464_v49 }
  0x8f   : > { %861 = vmatprep.subr.bf16.mxu0 %v2424_v55  ;;  %v468_v55 = vld [vmem:[#allocation3 + $0x188] sm:$0xff] }
  0x90   : > { %1077 = vmatmul.mubr.bf16.gmra.mrb[8].mxu1 %v487_v2 }
  0x91   : > { %1084 = vmatprep.mubr.bf16.mxu1 %v490_v3 }
  0x92   : > { %862 = vmatpush1.bf16.msra.mxu0 %v2427_v58 }
  0x93   : > { %863 = vmatprep.subr.bf16.mxu0 %v2429_v59  ;;  %v467_v59 = vld [vmem:[#allocation3 + $0x180] sm:$0xff] }
  0x94   : > { %v507_v63 = vpack.c.bf16 %v469_v60, %v467_v59 }
  0x96   : > { %864 = vmatpush1.bf16.msra.mxu0 %v2432_v62  ;;  %v474_v62 = vld [vmem:[#allocation3 + $0x1b8] sm:$0xff] }
  0x97   : > { %865 = vmatprep.subr.bf16.mxu0 %v2433_v1  ;;  %v510_v0 = vpack.c.bf16 %v474_v62, %v472_v61  ;;  %v471_v1 = vld [vmem:[#allocation3 + $0x1a0] sm:$0xff] }
  0x98   : > { %1085 = vmatmul.mubr.bf16.gmra.mrb[12].mxu1 %v489_v9 }
  0x99   : > { %1092 = vmatprep.mubr.bf16.mxu1 %v492_v10 }
  0x9a   : > { %866 = vmatpush1.bf16.msra.mxu0 %v2435_v4  ;;  %v478_v4 = vld [vmem:[#allocation3 + $0x1d8] sm:$0xff] }
  0x9d   : > { %868 = vmatmul.mubr.bf16.vlgmr.msra.gmra.mrb[0].mxu0 %v483_v46  ;;  %v504_v46 = vpack.c.bf16 %v462_v44, %v460_v43 }
  0x9e   : > { %877 = vmatprep.mubr.bf16.mxu0 %v486_v47  ;;  %v459_v47 = vld [vmem:[#allocation3 + $0x140] sm:$0xff] }
  0x9f   : > { %v503_v51 = vpack.c.bf16 %v461_v48, %v459_v47 }
  0xa0   : > { %1093 = vmatmul.mubr.bf16.gmra.mrb[16].mxu1 %v491_v15 }
  0xa1   : > { %1100 = vmatprep.mubr.bf16.mxu1 %v494_v16 }
  0xa5   : > { %878 = vmatmul.mubr.bf16.gmra.mrb[4].mxu0 %v485_v56  ;;  %v470_v56 = vld [vmem:[#allocation3 + $0x198] sm:$0xff] }
  0xa6   : > { %887 = vmatprep.mubr.bf16.mxu0 %v488_v57  ;;  %v505_v57 = vpack.c.bf16 %v465_v54, %v463_v53  ;;  %v508_v58 = vpack.c.bf16 %v470_v56, %v468_v55 }
  0xa8   : > { %1101 = vmatmul.mubr.bf16.gmra.mrb[20].mxu1 %v493_v21 }
  0xa9   : > { %1108 = vmatprep.mubr.bf16.mxu1 %v496_v22 }
  0xad   : > { %888 = vmatmul.mubr.bf16.gmra.mrb[8].mxu0 %v487_v2  ;;  %v473_v2 = vld [vmem:[#allocation3 + $0x1b0] sm:$0xff] }
  0xae   : > { %897 = vmatprep.mubr.bf16.mxu0 %v490_v3  ;;  %v476_v3 = vld [vmem:[#allocation3 + $0x1c8] sm:$0xff]  ;;  %v509_v5 = vpack.c.bf16 %v473_v2, %v471_v1 }
  0xaf   : > { %v512_v6 = vpack.c.bf16 %v478_v4, %v476_v3 }
  0xb0   : > { %1109 = vmatmul.mubr.bf16.gmra.mrb[24].mxu1 %v495_v27 }
  0xb1   : > { %1116 = vmatprep.mubr.bf16.mxu1 %v498_v28 }
  0xb5   : > { %898 = vmatmul.mubr.bf16.gmra.mrb[12].mxu0 %v489_v9  ;;  %v480_v9 = vld [vmem:[#allocation3 + $0x1e8] sm:$0xff] }
  0xb6   : > { %907 = vmatprep.mubr.bf16.mxu0 %v492_v10  ;;  %v482_v10 = vld [vmem:[#allocation3 + $0x1f8] sm:$0xff] }
  0xb7   : > { %v514_v12 = vpack.c.bf16 %v482_v10, %v480_v9 }
  0xb8   : > { %1117 = vmatmul.mubr.bf16.gmra.mrb[28].mxu1 %v497_v33 }
  0xb9   : > { %1124 = vmatprep.mubr.bf16.mxu1 %v500_v34 }
  0xbd   : > { %908 = vmatmul.mubr.bf16.gmra.mrb[16].mxu0 %v491_v15  ;;  %v513_v15 = vpack.c.bf16 %v481_v14, %v479_v13 }
  0xbe   : > { %917 = vmatprep.mubr.bf16.mxu0 %v494_v16 }
  0xc0   : > { %1125 = vmatmul.mubr.bf16.gmra.mrb[32].mxu1 %v499_v39 }
  0xc1   : > { %1132 = vmatprep.mubr.bf16.mxu1 %v502_v40 }
  0xc5   : > { %918 = vmatmul.mubr.bf16.gmra.mrb[20].mxu0 %v493_v21 }
  0xc6   : > { %927 = vmatprep.mubr.bf16.mxu0 %v496_v22 }
  0xc8   : > { %1133 = vmatmul.mubr.bf16.gmra.mrb[36].mxu1 %v501_v45 }
  0xc9   : > { %1140 = vmatprep.mubr.bf16.mxu1 %v504_v46 }
  0xcd   : > { %928 = vmatmul.mubr.bf16.gmra.mrb[24].mxu0 %v495_v27 }
  0xce   : > { %937 = vmatprep.mubr.bf16.mxu0 %v498_v28 }
  0xd0   : > { %1141 = vmatmul.mubr.bf16.gmra.mrb[40].mxu1 %v503_v51 }
  0xd1   : > { %1148 = vmatprep.mubr.bf16.mxu1 %v506_v52 }
  0xd5   : > { %938 = vmatmul.mubr.bf16.gmra.mrb[28].mxu0 %v497_v33 }
  0xd6   : > { %947 = vmatprep.mubr.bf16.mxu0 %v500_v34 }
  0xd8   : > { %1149 = vmatmul.mubr.bf16.gmra.mrb[44].mxu1 %v505_v57 }
  0xd9   : > { %1156 = vmatprep.mubr.bf16.mxu1 %v508_v58 }
  0xdd   : > { %948 = vmatmul.mubr.bf16.gmra.mrb[32].mxu0 %v499_v39 }
  0xde   : > { %957 = vmatprep.mubr.bf16.mxu0 %v502_v40 }
  0xe0   : > { %1157 = vmatmul.mubr.bf16.gmra.mrb[48].mxu1 %v507_v63 }
  0xe1   : > { %1164 = vmatprep.mubr.bf16.mxu1 %v510_v0 }
  0xe5   : > { %958 = vmatmul.mubr.bf16.gmra.mrb[36].mxu0 %v501_v45 }
  0xe6   : > { %967 = vmatprep.mubr.bf16.mxu0 %v504_v46 }
  0xe8   : > { %1165 = vmatmul.mubr.bf16.gmra.mrb[52].mxu1 %v509_v5 }
  0xe9   : > { %1172 = vmatprep.mubr.bf16.mxu1 %v512_v6 }
  0xed   : > { %968 = vmatmul.mubr.bf16.gmra.mrb[40].mxu0 %v503_v51 }
  0xee   : > { %977 = vmatprep.mubr.bf16.mxu0 %v506_v52 }
  0xf0   : > { %1173 = vmatmul.mubr.bf16.gmra.mrb[56].mxu1 %v511_v11 }
  0xf1   : > { %1180 = vmatprep.mubr.bf16.mxu1 %v514_v12 }
  0xf5   : > { %978 = vmatmul.mubr.bf16.gmra.mrb[44].mxu0 %v505_v57 }
  0xf6   : > { %987 = vmatprep.mubr.bf16.mxu0 %v508_v58 }
  0xf8   : > { %1181 = vmatmul.mubr.bf16.gmra.mrb[60].mxu1 %v513_v15 }
  0xfd   : > { %988 = vmatmul.mubr.bf16.gmra.mrb[48].mxu0 %v507_v63 }
  0xfe   : > { %997 = vmatprep.mubr.bf16.mxu0 %v510_v0 }
 0x105   : > { %998 = vmatmul.mubr.bf16.gmra.mrb[52].mxu0 %v509_v5 }
 0x106   : > { %1007 = vmatprep.mubr.bf16.mxu0 %v512_v6 }
 0x10d   : > { %1008 = vmatmul.mubr.bf16.gmra.mrb[56].mxu0 %v511_v11 }
 0x10e   : > { %1017 = vmatprep.mubr.bf16.mxu0 %v514_v12 }
 0x115   : > { %1018 = vmatmul.mubr.bf16.gmra.mrb[60].mxu0 %v513_v15 }
 0x153   : > { %v2193_v16 = vpop.f32.mrb[0].mxu1 }
 0x154   : > { %v2194_v17 = vpop.f32.mrb[1].mxu1 }
 0x155   : > { %v2195_v18 = vadd.f32 %v2194_v17, %v2193_v16  ;;  %v2196_v19 = vpop.f32.mrb[2].mxu1 }
 0x156   : > { %v2197_v20 = vpop.f32.mrb[3].mxu1 }
 0x157   : > { %v2113_v21 = vpack.c.bf16 %v2195_v18, %v2195_v18  ;;  %v2198_v22 = vadd.f32 %v2197_v20, %v2196_v19 }
 0x159   : > { %1801 = vst [vmem:[%s2835_s18 + $0x8] sm:$0xf] %v2113_v21  ;;  %v2115_v23 = vpack.c.bf16 %v2198_v22, %v2198_v22 }
 0x15b   : > { %1803 = vst [vmem:[%s2835_s18 + $0x14] sm:$0xf] %v2115_v23  ;;  %v2199_v24 = vpop.f32.mrb[4].mxu1 }
 0x15c   : > { %v2200_v25 = vpop.f32.mrb[5].mxu1 }
 0x15d   : > { %v2201_v26 = vadd.f32 %v2200_v25, %v2199_v24  ;;  %v2202_v27 = vpop.f32.mrb[6].mxu1 }
 0x15e   : > { %v2203_v28 = vpop.f32.mrb[7].mxu1 }
 0x15f   : > { %v2117_v29 = vpack.c.bf16 %v2201_v26, %v2201_v26  ;;  %v2204_v30 = vadd.f32 %v2203_v28, %v2202_v27 }
 0x161   : > { %1805 = vst [vmem:[%s2835_s18 + $0x20] sm:$0xf] %v2117_v29  ;;  %v2119_v31 = vpack.c.bf16 %v2204_v30, %v2204_v30 }
 0x163   : > { %1807 = vst [vmem:[%s2835_s18 + $0x2c] sm:$0xf] %v2119_v31  ;;  %v2205_v32 = vpop.f32.mrb[8].mxu1 }
 0x164   : > { %v2206_v33 = vpop.f32.mrb[9].mxu1 }
 0x165   : > { %v2207_v34 = vadd.f32 %v2206_v33, %v2205_v32  ;;  %v2208_v35 = vpop.f32.mrb[10].mxu1 }
 0x166   : > { %v2209_v36 = vpop.f32.mrb[11].mxu1 }
 0x167   : > { %v2121_v37 = vpack.c.bf16 %v2207_v34, %v2207_v34  ;;  %v2210_v38 = vadd.f32 %v2209_v36, %v2208_v35 }
 0x169   : > { %1809 = vst [vmem:[%s2835_s18 + $0x38] sm:$0xf] %v2121_v37  ;;  %v2123_v41 = vpack.c.bf16 %v2210_v38, %v2210_v38 }
 0x16b   : > { %1811 = vst [vmem:[%s2835_s18 + $0x44] sm:$0xf] %v2123_v41  ;;  %v2211_v45 = vpop.f32.mrb[12].mxu1 }
 0x16c   : > { %v2212_v47 = vpop.f32.mrb[13].mxu1 }
 0x16d   : > { %v2213_v48 = vadd.f32 %v2212_v47, %v2211_v45  ;;  %v2214_v49 = vpop.f32.mrb[14].mxu1 }
 0x16e   : > { %v2215_v50 = vpop.f32.mrb[15].mxu1 }
 0x16f   : > { %v2125_v51 = vpack.c.bf16 %v2213_v48, %v2213_v48  ;;  %v2216_v52 = vadd.f32 %v2215_v50, %v2214_v49 }
 0x170   : > { %v869_v39 = vpop.f32.mrb[0].mxu0 }
 0x171   : > { %v871_v40 = vpop.f32.mrb[1].mxu0  ;;  %1813 = vst [vmem:[%s2835_s18 + $0x50] sm:$0xf] %v2125_v51  ;;  %v2127_v55 = vpack.c.bf16 %v2216_v52, %v2216_v52 }
 0x172   : > { %v2112_v42 = vpack.c.bf16 %v871_v40, %v869_v39  ;;  %v873_v43 = vpop.f32.mrb[2].mxu0 }
 0x173   : > { %v875_v44 = vpop.f32.mrb[3].mxu0  ;;  %1815 = vst [vmem:[%s2835_s18 + $0x5c] sm:$0xf] %v2127_v55  ;;  %v2217_v59 = vpop.f32.mrb[16].mxu1 }
 0x174   : > { %1800 = vst [vmem:[%s2835_s18] sm:$0xff] %v2112_v42  ;;  %v2114_v46 = vpack.c.bf16 %v875_v44, %v873_v43  ;;  %v2218_v61 = vpop.f32.mrb[17].mxu1 }
 0x175   : > { %v2219_v62 = vadd.f32 %v2218_v61, %v2217_v59  ;;  %v2220_v63 = vpop.f32.mrb[18].mxu1 }
 0x176   : > { %1802 = vst [vmem:[%s2835_s18 + $0xc] sm:$0xff] %v2114_v46  ;;  %v2221_v0 = vpop.f32.mrb[19].mxu1 }
 0x177   : > { %v2129_v1 = vpack.c.bf16 %v2219_v62, %v2219_v62  ;;  %v2222_v2 = vadd.f32 %v2221_v0, %v2220_v63 }
 0x178   : > { %v879_v53 = vpop.f32.mrb[4].mxu0 }
 0x179   : > { %v881_v54 = vpop.f32.mrb[5].mxu0  ;;  %1817 = vst [vmem:[%s2835_s18 + $0x68] sm:$0xf] %v2129_v1  ;;  %v2131_v5 = vpack.c.bf16 %v2222_v2, %v2222_v2 }
 0x17a   : > { %v2116_v56 = vpack.c.bf16 %v881_v54, %v879_v53  ;;  %v883_v57 = vpop.f32.mrb[6].mxu0 }
 0x17b   : > { %v885_v58 = vpop.f32.mrb[7].mxu0  ;;  %1819 = vst [vmem:[%s2835_s18 + $0x74] sm:$0xf] %v2131_v5  ;;  %v2223_v9 = vpop.f32.mrb[20].mxu1 }
 0x17c   : > { %1804 = vst [vmem:[%s2835_s18 + $0x18] sm:$0xff] %v2116_v56  ;;  %v2118_v60 = vpack.c.bf16 %v885_v58, %v883_v57  ;;  %v2224_v11 = vpop.f32.mrb[21].mxu1 }
 0x17d   : > { %v2225_v12 = vadd.f32 %v2224_v11, %v2223_v9  ;;  %v2226_v13 = vpop.f32.mrb[22].mxu1 }
 0x17e   : > { %1806 = vst [vmem:[%s2835_s18 + $0x24] sm:$0xff] %v2118_v60  ;;  %v2227_v14 = vpop.f32.mrb[23].mxu1 }
 0x17f   : > { %v2133_v15 = vpack.c.bf16 %v2225_v12, %v2225_v12  ;;  %v2228_v16 = vadd.f32 %v2227_v14, %v2226_v13 }
 0x180   : > { %v889_v3 = vpop.f32.mrb[8].mxu0 }
 0x181   : > { %v891_v4 = vpop.f32.mrb[9].mxu0  ;;  %1821 = vst [vmem:[%s2835_s18 + $0x80] sm:$0xf] %v2133_v15  ;;  %v2135_v19 = vpack.c.bf16 %v2228_v16, %v2228_v16 }
 0x182   : > { %v2120_v6 = vpack.c.bf16 %v891_v4, %v889_v3  ;;  %v893_v7 = vpop.f32.mrb[10].mxu0 }
 0x183   : > { %v895_v8 = vpop.f32.mrb[11].mxu0  ;;  %1823 = vst [vmem:[%s2835_s18 + $0x8c] sm:$0xf] %v2135_v19  ;;  %v2229_v23 = vpop.f32.mrb[24].mxu1 }
 0x184   : > { %1808 = vst [vmem:[%s2835_s18 + $0x30] sm:$0xff] %v2120_v6  ;;  %v2122_v10 = vpack.c.bf16 %v895_v8, %v893_v7  ;;  %v2230_v25 = vpop.f32.mrb[25].mxu1 }
 0x185   : > { %v2231_v26 = vadd.f32 %v2230_v25, %v2229_v23  ;;  %v2232_v27 = vpop.f32.mrb[26].mxu1 }
 0x186   : > { %1810 = vst [vmem:[%s2835_s18 + $0x3c] sm:$0xff] %v2122_v10  ;;  %v2233_v28 = vpop.f32.mrb[27].mxu1 }
 0x187   : > { %v2137_v29 = vpack.c.bf16 %v2231_v26, %v2231_v26  ;;  %v2234_v30 = vadd.f32 %v2233_v28, %v2232_v27 }
 0x188   : > { %v899_v17 = vpop.f32.mrb[12].mxu0 }
 0x189   : > { %v901_v18 = vpop.f32.mrb[13].mxu0  ;;  %1825 = vst [vmem:[%s2835_s18 + $0x98] sm:$0xf] %v2137_v29  ;;  %v2139_v33 = vpack.c.bf16 %v2234_v30, %v2234_v30 }
 0x18a   : > { %v2124_v20 = vpack.c.bf16 %v901_v18, %v899_v17  ;;  %v903_v21 = vpop.f32.mrb[14].mxu0 }
 0x18b   : > { %v905_v22 = vpop.f32.mrb[15].mxu0  ;;  %1827 = vst [vmem:[%s2835_s18 + $0xa4] sm:$0xf] %v2139_v33  ;;  %v2235_v37 = vpop.f32.mrb[28].mxu1 }
 0x18c   : > { %1812 = vst [vmem:[%s2835_s18 + $0x48] sm:$0xff] %v2124_v20  ;;  %v2126_v24 = vpack.c.bf16 %v905_v22, %v903_v21  ;;  %v2236_v39 = vpop.f32.mrb[29].mxu1 }
 0x18d   : > { %v2237_v40 = vadd.f32 %v2236_v39, %v2235_v37  ;;  %v2238_v41 = vpop.f32.mrb[30].mxu1 }
 0x18e   : > { %1814 = vst [vmem:[%s2835_s18 + $0x54] sm:$0xff] %v2126_v24  ;;  %v2239_v42 = vpop.f32.mrb[31].mxu1 }
 0x18f   : > { %v2141_v43 = vpack.c.bf16 %v2237_v40, %v2237_v40  ;;  %v2240_v44 = vadd.f32 %v2239_v42, %v2238_v41 }
 0x190   : > { %v909_v31 = vpop.f32.mrb[16].mxu0 }
 0x191   : > { %v911_v32 = vpop.f32.mrb[17].mxu0  ;;  %1829 = vst [vmem:[%s2835_s18 + $0xb0] sm:$0xf] %v2141_v43  ;;  %v2143_v47 = vpack.c.bf16 %v2240_v44, %v2240_v44 }
 0x192   : > { %v2128_v34 = vpack.c.bf16 %v911_v32, %v909_v31  ;;  %v913_v35 = vpop.f32.mrb[18].mxu0 }
 0x193   : > { %v915_v36 = vpop.f32.mrb[19].mxu0  ;;  %1831 = vst [vmem:[%s2835_s18 + $0xbc] sm:$0xf] %v2143_v47  ;;  %v2241_v51 = vpop.f32.mrb[32].mxu1 }
 0x194   : > { %1816 = vst [vmem:[%s2835_s18 + $0x60] sm:$0xff] %v2128_v34  ;;  %v2130_v38 = vpack.c.bf16 %v915_v36, %v913_v35  ;;  %v2242_v53 = vpop.f32.mrb[33].mxu1 }
 0x195   : > { %v2243_v54 = vadd.f32 %v2242_v53, %v2241_v51  ;;  %v2244_v55 = vpop.f32.mrb[34].mxu1 }
 0x196   : > { %1818 = vst [vmem:[%s2835_s18 + $0x6c] sm:$0xff] %v2130_v38  ;;  %v2245_v56 = vpop.f32.mrb[35].mxu1 }
 0x197   : > { %v2145_v57 = vpack.c.bf16 %v2243_v54, %v2243_v54  ;;  %v2246_v58 = vadd.f32 %v2245_v56, %v2244_v55 }
 0x198   : > { %v919_v45 = vpop.f32.mrb[20].mxu0 }
 0x199   : > { %v921_v46 = vpop.f32.mrb[21].mxu0  ;;  %1833 = vst [vmem:[%s2835_s18 + $0xc8] sm:$0xf] %v2145_v57  ;;  %v2147_v61 = vpack.c.bf16 %v2246_v58, %v2246_v58 }
 0x19a   : > { %v2132_v48 = vpack.c.bf16 %v921_v46, %v919_v45  ;;  %v923_v49 = vpop.f32.mrb[22].mxu0 }
 0x19b   : > { %v925_v50 = vpop.f32.mrb[23].mxu0  ;;  %1835 = vst [vmem:[%s2835_s18 + $0xd4] sm:$0xf] %v2147_v61  ;;  %v2247_v1 = vpop.f32.mrb[36].mxu1 }
 0x19c   : > { %1820 = vst [vmem:[%s2835_s18 + $0x78] sm:$0xff] %v2132_v48  ;;  %v2134_v52 = vpack.c.bf16 %v925_v50, %v923_v49  ;;  %v2248_v3 = vpop.f32.mrb[37].mxu1 }
 0x19d   : > { %v2249_v4 = vadd.f32 %v2248_v3, %v2247_v1  ;;  %v2250_v5 = vpop.f32.mrb[38].mxu1 }
 0x19e   : > { %1822 = vst [vmem:[%s2835_s18 + $0x84] sm:$0xff] %v2134_v52  ;;  %v2251_v6 = vpop.f32.mrb[39].mxu1 }
 0x19f   : > { %v2149_v7 = vpack.c.bf16 %v2249_v4, %v2249_v4  ;;  %v2252_v8 = vadd.f32 %v2251_v6, %v2250_v5 }
 0x1a0   : > { %v929_v59 = vpop.f32.mrb[24].mxu0 }
 0x1a1   : > { %v931_v60 = vpop.f32.mrb[25].mxu0  ;;  %1837 = vst [vmem:[%s2835_s18 + $0xe0] sm:$0xf] %v2149_v7  ;;  %v2151_v11 = vpack.c.bf16 %v2252_v8, %v2252_v8 }
 0x1a2   : > { %v2136_v62 = vpack.c.bf16 %v931_v60, %v929_v59  ;;  %v933_v63 = vpop.f32.mrb[26].mxu0 }
 0x1a3   : > { %v935_v0 = vpop.f32.mrb[27].mxu0  ;;  %1839 = vst [vmem:[%s2835_s18 + $0xec] sm:$0xf] %v2151_v11  ;;  %v2253_v15 = vpop.f32.mrb[40].mxu1 }
 0x1a4   : > { %1824 = vst [vmem:[%s2835_s18 + $0x90] sm:$0xff] %v2136_v62  ;;  %v2138_v2 = vpack.c.bf16 %v935_v0, %v933_v63  ;;  %v2254_v17 = vpop.f32.mrb[41].mxu1 }
 0x1a5   : > { %v2255_v18 = vadd.f32 %v2254_v17, %v2253_v15  ;;  %v2256_v19 = vpop.f32.mrb[42].mxu1 }
 0x1a6   : > { %1826 = vst [vmem:[%s2835_s18 + $0x9c] sm:$0xff] %v2138_v2  ;;  %v2257_v20 = vpop.f32.mrb[43].mxu1 }
 0x1a7   : > { %v2153_v21 = vpack.c.bf16 %v2255_v18, %v2255_v18  ;;  %v2258_v22 = vadd.f32 %v2257_v20, %v2256_v19 }
 0x1a8   : > { %v939_v9 = vpop.f32.mrb[28].mxu0 }
 0x1a9   : > { %v941_v10 = vpop.f32.mrb[29].mxu0  ;;  %1841 = vst [vmem:[%s2835_s18 + $0xf8] sm:$0xf] %v2153_v21  ;;  %v2155_v25 = vpack.c.bf16 %v2258_v22, %v2258_v22 }
 0x1aa   : > { %v2140_v12 = vpack.c.bf16 %v941_v10, %v939_v9  ;;  %v943_v13 = vpop.f32.mrb[30].mxu0 }
 0x1ab   : > { %v945_v14 = vpop.f32.mrb[31].mxu0  ;;  %1843 = vst [vmem:[%s2835_s18 + $0x104] sm:$0xf] %v2155_v25  ;;  %v2259_v29 = vpop.f32.mrb[44].mxu1 }
 0x1ac   : > { %1828 = vst [vmem:[%s2835_s18 + $0xa8] sm:$0xff] %v2140_v12  ;;  %v2142_v16 = vpack.c.bf16 %v945_v14, %v943_v13  ;;  %v2260_v31 = vpop.f32.mrb[45].mxu1 }
 0x1ad   : > { %v2261_v32 = vadd.f32 %v2260_v31, %v2259_v29  ;;  %v2262_v33 = vpop.f32.mrb[46].mxu1 }
 0x1ae   : > { %1830 = vst [vmem:[%s2835_s18 + $0xb4] sm:$0xff] %v2142_v16  ;;  %v2263_v34 = vpop.f32.mrb[47].mxu1 }
 0x1af   : > { %v2157_v35 = vpack.c.bf16 %v2261_v32, %v2261_v32  ;;  %v2264_v36 = vadd.f32 %v2263_v34, %v2262_v33 }
 0x1b0   : > { %v949_v23 = vpop.f32.mrb[32].mxu0 }
 0x1b1   : > { %v951_v24 = vpop.f32.mrb[33].mxu0  ;;  %1845 = vst [vmem:[%s2835_s18 + $0x110] sm:$0xf] %v2157_v35  ;;  %v2159_v39 = vpack.c.bf16 %v2264_v36, %v2264_v36 }
 0x1b2   : > { %v2144_v26 = vpack.c.bf16 %v951_v24, %v949_v23  ;;  %v953_v27 = vpop.f32.mrb[34].mxu0 }
 0x1b3   : > { %v955_v28 = vpop.f32.mrb[35].mxu0  ;;  %1847 = vst [vmem:[%s2835_s18 + $0x11c] sm:$0xf] %v2159_v39  ;;  %v2265_v43 = vpop.f32.mrb[48].mxu1 }
 0x1b4   : > { %1832 = vst [vmem:[%s2835_s18 + $0xc0] sm:$0xff] %v2144_v26  ;;  %v2146_v30 = vpack.c.bf16 %v955_v28, %v953_v27  ;;  %v2266_v45 = vpop.f32.mrb[49].mxu1 }
 0x1b5   : > { %v2267_v46 = vadd.f32 %v2266_v45, %v2265_v43  ;;  %v2268_v47 = vpop.f32.mrb[50].mxu1 }
 0x1b6   : > { %1834 = vst [vmem:[%s2835_s18 + $0xcc] sm:$0xff] %v2146_v30  ;;  %v2269_v48 = vpop.f32.mrb[51].mxu1 }
 0x1b7   : > { %v2161_v49 = vpack.c.bf16 %v2267_v46, %v2267_v46  ;;  %v2270_v50 = vadd.f32 %v2269_v48, %v2268_v47 }
 0x1b8   : > { %v959_v37 = vpop.f32.mrb[36].mxu0 }
 0x1b9   : > { %v961_v38 = vpop.f32.mrb[37].mxu0  ;;  %1849 = vst [vmem:[%s2835_s18 + $0x128] sm:$0xf] %v2161_v49  ;;  %v2163_v53 = vpack.c.bf16 %v2270_v50, %v2270_v50 }
 0x1ba   : > { %v2148_v40 = vpack.c.bf16 %v961_v38, %v959_v37  ;;  %v963_v41 = vpop.f32.mrb[38].mxu0 }
 0x1bb   : > { %v965_v42 = vpop.f32.mrb[39].mxu0  ;;  %1851 = vst [vmem:[%s2835_s18 + $0x134] sm:$0xf] %v2163_v53  ;;  %v2271_v57 = vpop.f32.mrb[52].mxu1 }
 0x1bc   : > { %1836 = vst [vmem:[%s2835_s18 + $0xd8] sm:$0xff] %v2148_v40  ;;  %v2150_v44 = vpack.c.bf16 %v965_v42, %v963_v41  ;;  %v2272_v59 = vpop.f32.mrb[53].mxu1 }
 0x1bd   : > { %v2273_v60 = vadd.f32 %v2272_v59, %v2271_v57  ;;  %v2274_v61 = vpop.f32.mrb[54].mxu1 }
 0x1be   : > { %1838 = vst [vmem:[%s2835_s18 + $0xe4] sm:$0xff] %v2150_v44  ;;  %v2275_v62 = vpop.f32.mrb[55].mxu1 }
 0x1bf   : > { %v2165_v63 = vpack.c.bf16 %v2273_v60, %v2273_v60  ;;  %v2276_v0 = vadd.f32 %v2275_v62, %v2274_v61 }
 0x1c0   : > { %v969_v51 = vpop.f32.mrb[40].mxu0 }
 0x1c1   : > { %v971_v52 = vpop.f32.mrb[41].mxu0  ;;  %1853 = vst [vmem:[%s2835_s18 + $0x140] sm:$0xf] %v2165_v63  ;;  %v2167_v3 = vpack.c.bf16 %v2276_v0, %v2276_v0 }
 0x1c2   : > { %v2152_v54 = vpack.c.bf16 %v971_v52, %v969_v51  ;;  %v973_v55 = vpop.f32.mrb[42].mxu0 }
 0x1c3   : > { %v975_v56 = vpop.f32.mrb[43].mxu0  ;;  %1855 = vst [vmem:[%s2835_s18 + $0x14c] sm:$0xf] %v2167_v3  ;;  %v2277_v7 = vpop.f32.mrb[56].mxu1 }
 0x1c4   : > { %1840 = vst [vmem:[%s2835_s18 + $0xf0] sm:$0xff] %v2152_v54  ;;  %v2154_v58 = vpack.c.bf16 %v975_v56, %v973_v55  ;;  %v2278_v9 = vpop.f32.mrb[57].mxu1 }
 0x1c5   : > { %v2279_v10 = vadd.f32 %v2278_v9, %v2277_v7  ;;  %v2280_v11 = vpop.f32.mrb[58].mxu1 }
 0x1c6   : > { %1842 = vst [vmem:[%s2835_s18 + $0xfc] sm:$0xff] %v2154_v58  ;;  %v2281_v12 = vpop.f32.mrb[59].mxu1 }
 0x1c7   : > { %v2169_v13 = vpack.c.bf16 %v2279_v10, %v2279_v10  ;;  %v2282_v14 = vadd.f32 %v2281_v12, %v2280_v11 }
 0x1c8   : > { %v979_v1 = vpop.f32.mrb[44].mxu0 }
 0x1c9   : > { %v981_v2 = vpop.f32.mrb[45].mxu0  ;;  %1857 = vst [vmem:[%s2835_s18 + $0x158] sm:$0xf] %v2169_v13  ;;  %v2171_v17 = vpack.c.bf16 %v2282_v14, %v2282_v14 }
 0x1ca   : > { %v2156_v4 = vpack.c.bf16 %v981_v2, %v979_v1  ;;  %v983_v5 = vpop.f32.mrb[46].mxu0 }
 0x1cb   : > { %v985_v6 = vpop.f32.mrb[47].mxu0  ;;  %1859 = vst [vmem:[%s2835_s18 + $0x164] sm:$0xf] %v2171_v17  ;;  %v2283_v21 = vpop.f32.mrb[60].mxu1 }
 0x1cc   : > { %1844 = vst [vmem:[%s2835_s18 + $0x108] sm:$0xff] %v2156_v4  ;;  %v2158_v8 = vpack.c.bf16 %v985_v6, %v983_v5  ;;  %v2284_v23 = vpop.f32.mrb[61].mxu1 }
 0x1cd   : > { %v2285_v24 = vadd.f32 %v2284_v23, %v2283_v21  ;;  %v2286_v25 = vpop.f32.mrb[62].mxu1 }
 0x1ce   : > { %1846 = vst [vmem:[%s2835_s18 + $0x114] sm:$0xff] %v2158_v8  ;;  %v2287_v26 = vpop.f32.mrb[63].mxu1 }
 0x1cf   : > { %v2173_v27 = vpack.c.bf16 %v2285_v24, %v2285_v24  ;;  %v2288_v28 = vadd.f32 %v2287_v26, %v2286_v25 }
 0x1d0   : > { %v989_v15 = vpop.f32.mrb[48].mxu0 }
 0x1d1   : > { %v991_v16 = vpop.f32.mrb[49].mxu0  ;;  %1861 = vst [vmem:[%s2835_s18 + $0x170] sm:$0xf] %v2173_v27  ;;  %v2175_v31 = vpack.c.bf16 %v2288_v28, %v2288_v28 }
 0x1d2   : > { %v2160_v18 = vpack.c.bf16 %v991_v16, %v989_v15  ;;  %v993_v19 = vpop.f32.mrb[50].mxu0 }
 0x1d3   : > { %v995_v20 = vpop.f32.mrb[51].mxu0  ;;  %1863 = vst [vmem:[%s2835_s18 + $0x17c] sm:$0xf] %v2175_v31 }
 0x1d4   : > { %1848 = vst [vmem:[%s2835_s18 + $0x120] sm:$0xff] %v2160_v18  ;;  %v2162_v22 = vpack.c.bf16 %v995_v20, %v993_v19 }
 0x1d6   : > { %1850 = vst [vmem:[%s2835_s18 + $0x12c] sm:$0xff] %v2162_v22 }
 0x1d8   : > { %v999_v29 = vpop.f32.mrb[52].mxu0 }
 0x1d9   : > { %v1001_v30 = vpop.f32.mrb[53].mxu0 }
 0x1da   : > { %v2164_v32 = vpack.c.bf16 %v1001_v30, %v999_v29  ;;  %v1003_v33 = vpop.f32.mrb[54].mxu0 }
 0x1db   : > { %v1005_v34 = vpop.f32.mrb[55].mxu0 }
 0x1dc   : > { %1852 = vst [vmem:[%s2835_s18 + $0x138] sm:$0xff] %v2164_v32  ;;  %v2166_v35 = vpack.c.bf16 %v1005_v34, %v1003_v33 }
 0x1de   : > { %1854 = vst [vmem:[%s2835_s18 + $0x144] sm:$0xff] %v2166_v35 }
 0x1e0   : > { %v1009_v36 = vpop.f32.mrb[56].mxu0 }
 0x1e1   : > { %v1011_v37 = vpop.f32.mrb[57].mxu0 }
 0x1e2   : > { %v2168_v38 = vpack.c.bf16 %v1011_v37, %v1009_v36  ;;  %v1013_v39 = vpop.f32.mrb[58].mxu0 }
 0x1e3   : > { %v1015_v40 = vpop.f32.mrb[59].mxu0 }
 0x1e4   : > { %1856 = vst [vmem:[%s2835_s18 + $0x150] sm:$0xff] %v2168_v38  ;;  %v2170_v41 = vpack.c.bf16 %v1015_v40, %v1013_v39 }
 0x1e6   : > { %1858 = vst [vmem:[%s2835_s18 + $0x15c] sm:$0xff] %v2170_v41 }
 0x1e8   : > { %v1019_v42 = vpop.f32.mrb[60].mxu0 }
 0x1e9   : > { %v1021_v43 = vpop.f32.mrb[61].mxu0 }
 0x1ea   : > { %v2172_v44 = vpack.c.bf16 %v1021_v43, %v1019_v42  ;;  %v1023_v45 = vpop.f32.mrb[62].mxu0 }
 0x1eb   : > { %v1025_v46 = vpop.f32.mrb[63].mxu0 }
 0x1ec   : > { %1860 = vst [vmem:[%s2835_s18 + $0x168] sm:$0xff] %v2172_v44  ;;  %v2174_v47 = vpack.c.bf16 %v1025_v46, %v1023_v45 }
 0x1ee   : > { %1862 = vst [vmem:[%s2835_s18 + $0x174] sm:$0xff] %v2174_v47 }
 0x1ef   : > { %2507 = shalt.err (!%p2504_p8)
}
 0x1f0   : > { %s2508_s8 = scalar_lea.hbm %s2904_s16, 6144  ;;  %s2512_s24 = scalar_lea.hbm %s2959_s2, 12288 }
 0x1f1   : > { %p2509_p0 = scmp.ne.s32.totalorder %s2904_s16, %s2508_s8  ;;  %p2513_p12 = scmp.lt.u32.totalorder %s2904_s16, %s2959_s2 }
 0x1f2   : > { %p2514_p2 = scmp.lt.u32.totalorder %s2512_s24, %s2508_s8  ;;  %p2516_p10 = scmp.lt.u32.totalorder %s2508_s8, %s2904_s16 }
 0x1f3   : > { %p2510_p4 = pnand %p2509_p0, %p2980_p11 }
 0x1f4   : > { %p2515_p9 = por %p2514_p2, %p2513_p12 }
 0x1f5   : > { %p2511_p6 = pneg %p2510_p4 }
 0x1f6   : > { %p2517_p13 = por %p2516_p10, %p2515_p9 }
 0x1f8   : > { %p2518_p5 = pnand %p2517_p13, %p2511_p6 }
 0x1fa   : > { %2521 = shalt.err (!%p2518_p5)
}
 0x1fb   : > { %s2590_s27 = smov 192   ;;  %s2591_s18 = smov 384  }
 0x1fc   : > { %s2592_s20 = smov 12  }
 0x1fd   : > { %2297 = dma.vmem_to_hbm [thread:$0]  (%p2980_p11), %s2906_s23, 6144, %s2904_s16, %s1865_s12, %s2590_s27, %s2591_s18, %s2592_s20  }
 0x1fe PF: > { %s1896_s15 = sand.u32 1, %s2560_s9   ;;  %p2981_p1 = scmp.ne.s32.totalorder %s2970_s22, 0 }
 0x1ff   : > { %p2982_p3 = scmp.ge.s32.totalorder %s2580_s14, 2  ;;  %s1897_s26 = scalar_lea.sflag [#allocation5], %s1896_s15 }
 0x201   : > { %p2308_p7 = pnand %p2982_p3, %p2981_p1 }
 0x203   : > { %2555 = dma.done.wait (!%p2308_p7), %s1897_s26, 6144  }
 0x204   : > { %2557 = vsyncadd (!%p2308_p7), %s1897_s26, 4294961152  ;;  %s19_s14 = sadd.s32 1, %s2580_s14   ;;  %s2983_s9 = smov %s2564_s10 }
 0x205   : > { %p16_p8 = scmp.ge.s32.totalorder %s19_s14, 4   ;;  %s2984_s10 = smov %s2568_s11 }
 0x206   : > { %s2985_s11 = smov %s2734_s29  ;;  %s2986_s12 = smov %s2576_s13 }
 0x207   : > { %s2987_s13 = smov %s2989_s28  ;;  %18 = sbr.rel (!%p16_p8) target bundleno = 7 (0x7), region = 87 }
 0x20e   :  { %1902 = vsyncpa [#allocation4], 1 }
 0x20f   :  { %1904 = vsyncpa [#allocation4 + $0x1], 1 }
 0x210   :  { %1905 = vsyncpa [#allocation7], 1 }
 0x211   :  { %1907 = vsyncpa [#allocation7 + $0x1], 1 }
 0x212   :  { %1908 = vsyncpa [#allocation5], 1 }
 0x213   :  { %1910 = vsyncpa [#allocation5 + $0x1], 1 }

</bundles_post_ra>
